<compile_context>
chip_gen: v7x
topology: tpu7x:2x2x1
jax: 0.10.0
libtpu: 0.0.40
codegen_flags: <defaults>
</compile_context>

<pallas_src>
import functools
import math

import numpy as np
import jax
import jax.numpy as jnp
from jax.experimental import pallas as pl
from jax.experimental.pallas import tpu as pltpu

POOL_SIZES = (1, 2, 3, 6)
POOL_OFFS = (0, 1, 5, 14, 50)      # row offsets of each pooled map in the stacked layout
R_TOTAL = POOL_OFFS[-1]            # 50 pooled rows total
BN_EPS = 1e-5
VMEM_LIMIT = 48 * 1024 * 1024      # safe on v5e/v6e/v7x


# --------------------------------------------------------------------------
# Kernel 1: pooling matmul (HW-tiled reduction) + four 1x1 conv/BN/ReLU branches.
# --------------------------------------------------------------------------
def _branch_kernel(x_ref, p_ref, w_ref, scale_ref, shift_ref, o_ref, acc_ref):
    # x_ref: (1, THW, C) bf16   p_ref: (R, THW) bf16   w_ref: (4, C, Cout_pad) bf16
    # scale/shift: (4, 1, Cout_pad) f32   o_ref: (1, R, Cout_pad) bf16
    # acc_ref: (R, C) f32 scratch (pooled accumulator, persists across the HW axis)
    j = pl.program_id(1)

    @pl.when(j == 0)
    def _():
        acc_ref[...] = jnp.zeros_like(acc_ref)

    acc_ref[...] += jnp.dot(p_ref[...], x_ref[0],
                            preferred_element_type=jnp.float32)

    @pl.when(j == pl.num_programs(1) - 1)
    def _():
        pooled = acc_ref[...].astype(jnp.bfloat16)                  # (R, C)
        for b in range(4):
            r0, r1 = POOL_OFFS[b], POOL_OFFS[b + 1]
            yb = jnp.dot(pooled[r0:r1, :], w_ref[b],
                         preferred_element_type=jnp.float32)
            yb = jnp.maximum(yb * scale_ref[b] + shift_ref[b], 0.0)
            o_ref[0, r0:r1, :] = yb.astype(o_ref.dtype)


# --------------------------------------------------------------------------
# Kernel 2: fusion bottleneck.  Grid = (N, row tiles, Cin tiles).
# x contribution: manual DMA of a (TR+2)-row halo window of the flattened
# zero-padded input; nine shifted-window matmuls.  Pyramid contribution:
# (rows x R) @ (R x Cout) matmuls against the resident selection matrix S and
# per-image pre-multiplied branch weights Z (added once, at k == 0).
# --------------------------------------------------------------------------
def _fusion_kernel(x_hbm, s_ref, z_ref, wx_ref, scale_ref, shift_ref,
                   o_ref, xbuf, acc_ref, sem,
                   *, W, TR, pad_top, guard_top):
    n = pl.program_id(0)
    t = pl.program_id(1)
    k = pl.program_id(2)

    W2 = W + 2
    NRW = (TR + 2) * W2                  # rows of the flat halo window
    TC = xbuf.shape[1]
    GT = guard_top
    GB = xbuf.shape[0] - GT - NRW

    row0_flat = t * (TR * W2)            # first padded-flat row of this tile

    # Guard rows are never written by the DMA; keep them zeroed so the
    # (discarded) accumulator rows they feed stay finite.
    xbuf[0:GT, :] = jnp.zeros((GT, TC), xbuf.dtype)
    xbuf[GT + NRW:, :] = jnp.zeros((GB, TC), xbuf.dtype)

    # Async fetch of this (row tile, channel tile) window of the padded input.
    cp = pltpu.make_async_copy(
        x_hbm.at[n, pl.ds(row0_flat, NRW), pl.ds(k * TC, TC)],
        xbuf.at[pl.ds(GT, NRW), :],
        sem)
    cp.start()

    # Once per (n, t): init accumulator and add the pyramid-branch contribution
    # (overlaps with the x DMA above).
    @pl.when(k == 0)
    def _():
        acc_ref[...] = jnp.zeros_like(acc_ref)
        for dy in range(3):
            for dx in range(3):
                s = dy * W2 + dx - 1
                s_win = s_ref[pl.ds(pad_top + row0_flat + s, NRW), :]   # (NRW, R)
                acc_ref[...] += jnp.dot(s_win, z_ref[0, dy, dx],
                                        preferred_element_type=jnp.float32)

    cp.wait()

    # x-part of the 3x3 conv for this channel tile: nine shifted windows of the
    # flat padded tile (static offsets), each a clean 2-D MXU matmul.
    for dy in range(3):
        for dx in range(3):
            s = dy * W2 + dx - 1
            xs = xbuf[pl.ds(GT + s, NRW), :]                            # (NRW, TC)
            acc_ref[...] += jnp.dot(xs, wx_ref[dy, dx],
                                    preferred_element_type=jnp.float32)

    # Finalize: extract the valid (TR, W) region, folded BN + ReLU, store.
    @pl.when(k == pl.num_programs(2) - 1)
    def _():
        scale = scale_ref[0, 0]
        shift = shift_ref[0, 0]
        for h in range(TR):
            row = acc_ref[pl.ds(h * W2 + 1, W), :]                      # (W, Cout_pad)
            o_ref[0, h] = jnp.maximum(row * scale + shift, 0.0).astype(o_ref.dtype)


# --------------------------------------------------------------------------
# Parameter init (mirrors PSP_head.__init__): conv weights ~ N(0, sqrt(2/n)),
# n = kh*kw*out_channels; BatchNorm weight=1, bias=0, running mean=0, var=1.
# --------------------------------------------------------------------------
def init_psp_head_params(key, in_channels):
    out_channels = in_channels // 4
    keys = jax.random.split(key, 5)
    std1 = math.sqrt(2.0 / (1 * 1 * out_channels))
    branch_w = [std1 * jax.random.normal(keys[b],
                                         (out_channels, in_channels, 1, 1),
                                         jnp.float32) for b in range(4)]
    std3 = math.sqrt(2.0 / (3 * 3 * out_channels))
    fusion_w = std3 * jax.random.normal(keys[4],
                                        (out_channels, in_channels * 2, 3, 3),
                                        jnp.float32)
    bn = dict(gamma=jnp.ones((out_channels,), jnp.float32),
              beta=jnp.zeros((out_channels,), jnp.float32),
              mean=jnp.zeros((out_channels,), jnp.float32),
              var=jnp.ones((out_channels,), jnp.float32))
    return dict(branch_w=branch_w, fusion_w=fusion_w,
                branch_bn=[bn] * 4, fusion_bn=bn)


def _fold_bn(bn):
    scale = bn["gamma"] / jnp.sqrt(bn["var"] + BN_EPS)
    shift = bn["beta"] - bn["mean"] * scale
    return scale, shift


def _pool_matrix(H, W, k):
    """Averaging matrix (k*k, H*W) reproducing adaptive_avg_pool2d(x, k)."""
    P = np.zeros((k * k, H * W), np.float32)
    for i in range(k):
        hs = (i * H) // k
        he = -((-(i + 1) * H) // k)
        for j in range(k):
            ws = (j * W) // k
            we = -((-(j + 1) * W) // k)
            area = float((he - hs) * (we - ws))
            for hh in range(hs, he):
                P[i * k + j, hh * W + ws: hh * W + we] = 1.0 / area
    return P


def _upsample_pad_select(H, W, pad_top, pad_bot):
    """0/1 matrix: flat zero-padded pixel index -> stacked pooled row.
    Encodes nearest-neighbour F.interpolate back to (H, W) plus the conv pad."""
    W2 = W + 2
    S = np.zeros((pad_top + (H + 2) * W2 + pad_bot, R_TOTAL), np.float32)
    for b, k in enumerate(POOL_SIZES):
        for h in range(H):
            i = (h * k) // H
            for w in range(W):
                j = (w * k) // W
                p = (h + 1) * W2 + (w + 1)
                S[pad_top + p, POOL_OFFS[b] + i * k + j] = 1.0
    return S


def _pick_tile(n, cap, multiple):
    best = 0
    for d in range(multiple, min(n, cap) + 1, multiple):
        if n % d == 0:
            best = d
    return best if best > 0 else n


# --------------------------------------------------------------------------
# Forward
# --------------------------------------------------------------------------
def psp_head_forward(params, x_nchw):
    N, C, H, W = x_nchw.shape
    assert C % 4 == 0
    Cout = C // 4
    Cout_pad = max(128, ((Cout + 127) // 128) * 128)    # lane-dense outputs
    HW = H * W
    W2 = W + 2
    R = R_TOTAL

    # tile sizes (keep (8,128) layout constraints; fall back to full dims)
    THW = _pick_tile(HW, max(128, min(2048, HW // 2)), 128)   # branch HW reduction
    TR = _pick_tile(H, 8, 1)                                  # fusion output rows
    TC = _pick_tile(C, max(8, min(256, C // 2)), 8)           # fusion Cin reduction
    NRW = (TR + 2) * W2
    GUARD_TOP, GUARD_BOT = 8, 2 * W2 + 8
    PAD_TOP, PAD_BOT = 8, 2 * W2 + 8

    # ---- layout: channels-last, bf16 MXU operands ----
    # TODO(synk): the NCHW->NHWC transpose of the full input is still an XLA pass;
    # it could be folded away by consuming (N, C, HW) in the branch kernel.
    x_nhwc = jnp.transpose(x_nchw, (0, 2, 3, 1)).astype(jnp.bfloat16)   # (N, H, W, C)
    x_flat = x_nhwc.reshape(N, HW, C)
    # zero-pad H/W by 1 (3x3 conv padding) and flatten spatial dims so each
    # fusion row tile + halo is one contiguous DMA window.
    x_pad_flat = jnp.pad(x_nhwc, ((0, 0), (1, 1), (1, 1), (0, 0))
                         ).reshape(N, (H + 2) * W2, C)

    # ---- stage 1: adaptive avg-pools + four 1x1 conv/BN/ReLU branches ----
    P = np.concatenate([_pool_matrix(H, W, k) for k in POOL_SIZES], axis=0)  # (R, HW)
    P = jnp.asarray(P, jnp.bfloat16)

    w_br = jnp.stack([jnp.transpose(w[:, :, 0, 0], (1, 0))
                      for w in params["branch_w"]])                 # (4, C, Cout)
    w_br = jnp.pad(w_br, ((0, 0), (0, 0), (0, Cout_pad - Cout))).astype(jnp.bfloat16)
    br_scale, br_shift = [], []
    for bn in params["branch_bn"]:
        s, t = _fold_bn(bn)
        br_scale.append(s)
        br_shift.append(t)
    pad_c = ((0, 0), (0, Cout_pad - Cout))
    br_scale = jnp.pad(jnp.stack(br_scale), pad_c)[:, None, :]      # (4, 1, Cout_pad)
    br_shift = jnp.pad(jnp.stack(br_shift), pad_c)[:, None, :]

    branch_out = pl.pallas_call(
        _branch_kernel,
        out_shape=jax.ShapeDtypeStruct((N, R, Cout_pad), jnp.bfloat16),
        grid_spec=pltpu.PrefetchScalarGridSpec(
            num_scalar_prefetch=0,
            grid=(N, HW // THW),
            in_specs=[
                pl.BlockSpec((1, THW, C), lambda n, j: (n, j, 0)),
                pl.BlockSpec((R, THW), lambda n, j: (0, j)),
                pl.BlockSpec((4, C, Cout_pad), lambda n, j: (0, 0, 0)),
                pl.BlockSpec((4, 1, Cout_pad), lambda n, j: (0, 0, 0)),
                pl.BlockSpec((4, 1, Cout_pad), lambda n, j: (0, 0, 0)),
            ],
            out_specs=pl.BlockSpec((1, R, Cout_pad), lambda n, j: (n, 0, 0)),
            scratch_shapes=[pltpu.VMEM((R, C), jnp.float32)],
        ),
        compiler_params=pltpu.CompilerParams(
            dimension_semantics=("parallel", "arbitrary"),
            vmem_limit_bytes=VMEM_LIMIT),
    )(x_flat, P, w_br, br_scale, br_shift)

    # ---- stage 2 prep: fold upsample + concat + pad into the fusion kernel ----
    w_fu = jnp.transpose(params["fusion_w"], (2, 3, 1, 0))          # (3, 3, 2C, Cout)
    w_x = jnp.pad(w_fu[:, :, :C, :],
                  ((0, 0), (0, 0), (0, 0), (0, Cout_pad - Cout))
                  ).astype(jnp.bfloat16)                            # (3, 3, C, Cout_pad)
    w_b = w_fu[:, :, C:, :].reshape(3, 3, 4, Cout, Cout)            # branch half of the 3x3 weight

    # tiny per-image Z tensors: pooled branch maps pre-multiplied by the branch
    # half of the fusion weight (50 rows total) -> in-kernel the pyramid half of
    # the conv is just (rows x 50) @ (50 x Cout) matmuls; the (N, H, W, 2C)
    # concat never hits HBM.
    z_parts = []
    for b in range(4):
        pb = branch_out[:, POOL_OFFS[b]:POOL_OFFS[b + 1], :Cout].astype(jnp.float32)
        z_parts.append(jnp.einsum('nrc,yxcd->nyxrd', pb, w_b[:, :, b]))
    z_all = jnp.concatenate(z_parts, axis=3)                        # (N, 3, 3, R, Cout)
    z_all = jnp.pad(z_all, ((0, 0), (0, 0), (0, 0), (0, 0), (0, Cout_pad - Cout))
                    ).astype(jnp.bfloat16)

    S = jnp.asarray(_upsample_pad_select(H, W, PAD_TOP, PAD_BOT), jnp.bfloat16)

    fu_scale, fu_shift = _fold_bn(params["fusion_bn"])
    fu_scale = jnp.pad(fu_scale, (0, Cout_pad - Cout)).reshape(1, 1, Cout_pad)
    fu_shift = jnp.pad(fu_shift, (0, Cout_pad - Cout)).reshape(1, 1, Cout_pad)

    fusion = functools.partial(_fusion_kernel, W=W, TR=TR,
                               pad_top=PAD_TOP, guard_top=GUARD_TOP)
    out_nhwc = pl.pallas_call(
        fusion,
        out_shape=jax.ShapeDtypeStruct((N, H, W, Cout_pad), jnp.float32),
        grid_spec=pltpu.PrefetchScalarGridSpec(
            num_scalar_prefetch=0,
            grid=(N, H // TR, C // TC),
            in_specs=[
                pl.BlockSpec(memory_space=pl.ANY),                          # x_pad_flat (HBM)
                pl.BlockSpec((S.shape[0], R), lambda n, t, k: (0, 0)),      # S (resident)
                pl.BlockSpec((1, 3, 3, R, Cout_pad), lambda n, t, k: (n, 0, 0, 0, 0)),
                pl.BlockSpec((3, 3, TC, Cout_pad), lambda n, t, k: (0, 0, k, 0)),
                pl.BlockSpec((1, 1, Cout_pad), lambda n, t, k: (0, 0, 0)),
                pl.BlockSpec((1, 1, Cout_pad), lambda n, t, k: (0, 0, 0)),
            ],
            out_specs=pl.BlockSpec((1, TR, W, Cout_pad), lambda n, t, k: (n, t, 0, 0)),
            scratch_shapes=[
                pltpu.VMEM((GUARD_TOP + NRW + GUARD_BOT, TC), jnp.bfloat16),  # x halo buffer
                pltpu.VMEM((NRW, Cout_pad), jnp.float32),                     # conv accumulator
                pltpu.SemaphoreType.DMA(()),
            ],
        ),
        compiler_params=pltpu.CompilerParams(
            dimension_semantics=("parallel", "parallel", "arbitrary"),
            vmem_limit_bytes=VMEM_LIMIT),
    )(x_pad_flat, S, z_all, w_x, fu_scale, fu_shift)

    # TODO(synk): Dropout2d(0.1) is stochastic only in train mode; identity here.
    out = out_nhwc[..., :Cout]
    return jnp.transpose(out, (0, 3, 1, 2))                          # NCHW


if __name__ == "__main__":
    key = jax.random.PRNGKey(0)
    k_param, k_x = jax.random.split(key)

    in_channels = 16                     # divisible by 4 (Cout = 4)
    N, H, W = 2, 16, 16
    params = init_psp_head_params(k_param, in_channels)
    x = jax.random.normal(k_x, (N, in_channels, H, W), jnp.float32)

    out = psp_head_forward(params, x)
    out = jax.block_until_ready(out)
    assert out.shape == (N, in_channels // 4, H, W), out.shape
    assert bool(jnp.all(jnp.isfinite(out)))
    print("KERNEL_OK")
</pallas_src>

<mosaic_0001>
module attributes {stable_mosaic.version = 11 : i64} {
  func.func @_branch_kernel(%arg0: i32, %arg1: i32, %arg2: memref<1x128x16xbf16, #tpu.memory_space<vmem>>, %arg3: memref<50x128xbf16, #tpu.memory_space<vmem>>, %arg4: memref<4x16x128xbf16, #tpu.memory_space<vmem>>, %arg5: memref<4x1x128xf32, #tpu.memory_space<vmem>>, %arg6: memref<4x1x128xf32, #tpu.memory_space<vmem>>, %arg7: memref<1x50x128xbf16, #tpu.memory_space<vmem>>, %arg8: memref<50x16xf32, #tpu.memory_space<vmem>>) attributes {dimension_semantics = [#tpu.dimension_semantics<parallel>, #tpu.dimension_semantics<arbitrary>], iteration_bounds = array<i64: 2, 2>, scalar_prefetch = 0 : i64, scratch_operands = 1 : i64, tpu.core_type = #tpu.core_type<tc>, window_params = [{transform_indices = @transform_0, window_bounds = array<i64: 1, 128, 16>}, {transform_indices = @transform_1, window_bounds = array<i64: 50, 128>}, {pipeline_mode = #tpu.pipeline_mode<synchronous>, transform_indices = @transform_2, window_bounds = array<i64: 4, 16, 128>}, {pipeline_mode = #tpu.pipeline_mode<synchronous>, transform_indices = @transform_3, window_bounds = array<i64: 4, 1, 128>}, {pipeline_mode = #tpu.pipeline_mode<synchronous>, transform_indices = @transform_4, window_bounds = array<i64: 4, 1, 128>}, {transform_indices = @transform_5, window_bounds = array<i64: 1, 50, 128>}]} {
    %c0_i32 = arith.constant 0 : i32
    %0 = arith.cmpi eq, %arg1, %c0_i32 : i32
    %1 = arith.extui %0 : i1 to i32
    %c0_i32_0 = arith.constant 0 : i32
    %2 = arith.cmpi ne, %1, %c0_i32_0 : i32
    scf.if %2 {
      %cst_10 = arith.constant 0.000000e+00 : f32
      %13 = vector.broadcast %cst_10 : f32 to vector<50x16xf32>
      %c0_11 = arith.constant 0 : index
      %c0_12 = arith.constant 0 : index
      %14 = vector.load %arg8[%c0_11, %c0_12] : memref<50x16xf32, #tpu.memory_space<vmem>>, vector<50x16xf32>
      tpu.vector_store %arg8[%c0_11, %c0_12], %13 {strides = array<i32>} : memref<50x16xf32, #tpu.memory_space<vmem>>, vector<50x16xf32>,
    } else {
    }
    %c0 = arith.constant 0 : index
    %c0_1 = arith.constant 0 : index
    %3 = vector.load %arg8[%c0, %c0_1] : memref<50x16xf32, #tpu.memory_space<vmem>>, vector<50x16xf32>
    %c0_2 = arith.constant 0 : index
    %c0_3 = arith.constant 0 : index
    %4 = vector.load %arg3[%c0_2, %c0_3] : memref<50x128xbf16, #tpu.memory_space<vmem>>, vector<50x128xbf16>
    %c0_4 = arith.constant 0 : index
    %c0_5 = arith.constant 0 : index
    %c0_6 = arith.constant 0 : index
    %5 = vector.load %arg2[%c0_4, %c0_5, %c0_6] : memref<1x128x16xbf16, #tpu.memory_space<vmem>>, vector<1x128x16xbf16>
    %6 = vector.shape_cast %5 : vector<1x128x16xbf16> to vector<128x16xbf16>
    %cst = arith.constant dense<0.000000e+00> : vector<50x16xf32>
    %7 = tpu.matmul %4, %6, %cst {dimension_numbers = #tpu.dot_dimension_numbers<[1], [0], [0], [1], [0, 0, 1, 1], [], []>} : vector<50x128xbf16>, vector<128x16xbf16>, vector<50x16xf32> -> vector<50x16xf32>
    %8 = arith.addf %3, %7 : vector<50x16xf32>
    %c0_7 = arith.constant 0 : index
    %c0_8 = arith.constant 0 : index
    %9 = vector.load %arg8[%c0_7, %c0_8] : memref<50x16xf32, #tpu.memory_space<vmem>>, vector<50x16xf32>
    tpu.vector_store %arg8[%c0_7, %c0_8], %8 {strides = array<i32>} : memref<50x16xf32, #tpu.memory_space<vmem>>, vector<50x16xf32>,
    %c1_i32 = arith.constant 1 : i32
    %10 = arith.cmpi eq, %arg1, %c1_i32 : i32
    %11 = arith.extui %10 : i1 to i32
    %c0_i32_9 = arith.constant 0 : i32
    %12 = arith.cmpi ne, %11, %c0_i32_9 : i32
    scf.if %12 {
      %c0_10 = arith.constant 0 : index
      %c0_11 = arith.constant 0 : index
      %13 = vector.load %arg8[%c0_10, %c0_11] : memref<50x16xf32, #tpu.memory_space<vmem>>, vector<50x16xf32>
      %14 = arith.truncf %13 : vector<50x16xf32> to vector<50x16xbf16>
      %15 = vector.extract_strided_slice %14 {offsets = [0, 0], sizes = [1, 16], strides = [1, 1]} : vector<50x16xbf16> to vector<1x16xbf16>
      %c0_12 = arith.constant 0 : index
      %c0_13 = arith.constant 0 : index
      %c0_14 = arith.constant 0 : index
      %16 = vector.load %arg4[%c0_12, %c0_13, %c0_14] : memref<4x16x128xbf16, #tpu.memory_space<vmem>>, vector<1x16x128xbf16>
      %17 = vector.shape_cast %16 : vector<1x16x128xbf16> to vector<16x128xbf16>
      %cst_15 = arith.constant dense<0.000000e+00> : vector<1x128xf32>
      %18 = tpu.matmul %15, %17, %cst_15 {dimension_numbers = #tpu.dot_dimension_numbers<[1], [0], [0], [1], [0, 0, 1, 1], [], []>} : vector<1x16xbf16>, vector<16x128xbf16>, vector<1x128xf32> -> vector<1x128xf32>
      %c0_16 = arith.constant 0 : index
      %c0_17 = arith.constant 0 : index
      %c0_18 = arith.constant 0 : index
      %19 = vector.load %arg5[%c0_16, %c0_17, %c0_18] : memref<4x1x128xf32, #tpu.memory_space<vmem>>, vector<1x1x128xf32>
      %20 = vector.shape_cast %19 : vector<1x1x128xf32> to vector<1x128xf32>
      %21 = arith.mulf %18, %20 : vector<1x128xf32>
      %c0_19 = arith.constant 0 : index
      %c0_20 = arith.constant 0 : index
      %c0_21 = arith.constant 0 : index
      %22 = vector.load %arg6[%c0_19, %c0_20, %c0_21] : memref<4x1x128xf32, #tpu.memory_space<vmem>>, vector<1x1x128xf32>
      %23 = vector.shape_cast %22 : vector<1x1x128xf32> to vector<1x128xf32>
      %24 = arith.addf %21, %23 : vector<1x128xf32>
      %cst_22 = arith.constant 0.000000e+00 : f32
      %25 = vector.broadcast %cst_22 : f32 to vector<1x128xf32>
      %26 = arith.maximumf %24, %25 : vector<1x128xf32>
      %27 = arith.truncf %26 : vector<1x128xf32> to vector<1x128xbf16>
      %c0_23 = arith.constant 0 : index
      %c0_24 = arith.constant 0 : index
      %c0_25 = arith.constant 0 : index
      %28 = vector.load %arg7[%c0_23, %c0_24, %c0_25] : memref<1x50x128xbf16, #tpu.memory_space<vmem>>, vector<1x1x128xbf16>
      %29 = vector.shape_cast %28 : vector<1x1x128xbf16> to vector<1x128xbf16>
      %30 = vector.shape_cast %27 : vector<1x128xbf16> to vector<1x1x128xbf16>
      tpu.vector_store %arg7[%c0_23, %c0_24, %c0_25], %30 {strides = array<i32>} : memref<1x50x128xbf16, #tpu.memory_space<vmem>>, vector<1x1x128xbf16>,
      %31 = vector.extract_strided_slice %14 {offsets = [1, 0], sizes = [4, 16], strides = [1, 1]} : vector<50x16xbf16> to vector<4x16xbf16>
      %c1 = arith.constant 1 : index
      %c0_26 = arith.constant 0 : index
      %c0_27 = arith.constant 0 : index
      %32 = vector.load %arg4[%c1, %c0_26, %c0_27] : memref<4x16x128xbf16, #tpu.memory_space<vmem>>, vector<1x16x128xbf16>
      %33 = vector.shape_cast %32 : vector<1x16x128xbf16> to vector<16x128xbf16>
      %cst_28 = arith.constant dense<0.000000e+00> : vector<4x128xf32>
      %34 = tpu.matmul %31, %33, %cst_28 {dimension_numbers = #tpu.dot_dimension_numbers<[1], [0], [0], [1], [0, 0, 1, 1], [], []>} : vector<4x16xbf16>, vector<16x128xbf16>, vector<4x128xf32> -> vector<4x128xf32>
      %c1_29 = arith.constant 1 : index
      %c0_30 = arith.constant 0 : index
      %c0_31 = arith.constant 0 : index
      %35 = vector.load %arg5[%c1_29, %c0_30, %c0_31] : memref<4x1x128xf32, #tpu.memory_space<vmem>>, vector<1x1x128xf32>
      %36 = vector.shape_cast %35 : vector<1x1x128xf32> to vector<1x128xf32>
      %37 = vector.broadcast %36 : vector<1x128xf32> to vector<4x128xf32>
      %38 = arith.mulf %34, %37 : vector<4x128xf32>
      %c1_32 = arith.constant 1 : index
      %c0_33 = arith.constant 0 : index
      %c0_34 = arith.constant 0 : index
      %39 = vector.load %arg6[%c1_32, %c0_33, %c0_34] : memref<4x1x128xf32, #tpu.memory_space<vmem>>, vector<1x1x128xf32>
      %40 = vector.shape_cast %39 : vector<1x1x128xf32> to vector<1x128xf32>
      %41 = vector.broadcast %40 : vector<1x128xf32> to vector<4x128xf32>
      %42 = arith.addf %38, %41 : vector<4x128xf32>
      %cst_35 = arith.constant 0.000000e+00 : f32
      %43 = vector.broadcast %cst_35 : f32 to vector<4x128xf32>
      %44 = arith.maximumf %42, %43 : vector<4x128xf32>
      %45 = arith.truncf %44 : vector<4x128xf32> to vector<4x128xbf16>
      %c0_36 = arith.constant 0 : index
      %c1_37 = arith.constant 1 : index
      %c0_38 = arith.constant 0 : index
      %46 = vector.load %arg7[%c0_36, %c1_37, %c0_38] : memref<1x50x128xbf16, #tpu.memory_space<vmem>>, vector<1x4x128xbf16>
      %47 = vector.shape_cast %46 : vector<1x4x128xbf16> to vector<4x128xbf16>
      %48 = vector.shape_cast %45 : vector<4x128xbf16> to vector<1x4x128xbf16>
      tpu.vector_store %arg7[%c0_36, %c1_37, %c0_38], %48 {strides = array<i32>} : memref<1x50x128xbf16, #tpu.memory_space<vmem>>, vector<1x4x128xbf16>,
      %49 = vector.extract_strided_slice %14 {offsets = [5, 0], sizes = [9, 16], strides = [1, 1]} : vector<50x16xbf16> to vector<9x16xbf16>
      %c2 = arith.constant 2 : index
      %c0_39 = arith.constant 0 : index
      %c0_40 = arith.constant 0 : index
      %50 = vector.load %arg4[%c2, %c0_39, %c0_40] : memref<4x16x128xbf16, #tpu.memory_space<vmem>>, vector<1x16x128xbf16>
      %51 = vector.shape_cast %50 : vector<1x16x128xbf16> to vector<16x128xbf16>
      %cst_41 = arith.constant dense<0.000000e+00> : vector<9x128xf32>
      %52 = tpu.matmul %49, %51, %cst_41 {dimension_numbers = #tpu.dot_dimension_numbers<[1], [0], [0], [1], [0, 0, 1, 1], [], []>} : vector<9x16xbf16>, vector<16x128xbf16>, vector<9x128xf32> -> vector<9x128xf32>
      %c2_42 = arith.constant 2 : index
      %c0_43 = arith.constant 0 : index
      %c0_44 = arith.constant 0 : index
      %53 = vector.load %arg5[%c2_42, %c0_43, %c0_44] : memref<4x1x128xf32, #tpu.memory_space<vmem>>, vector<1x1x128xf32>
      %54 = vector.shape_cast %53 : vector<1x1x128xf32> to vector<1x128xf32>
      %55 = vector.broadcast %54 : vector<1x128xf32> to vector<9x128xf32>
      %56 = arith.mulf %52, %55 : vector<9x128xf32>
      %c2_45 = arith.constant 2 : index
      %c0_46 = arith.constant 0 : index
      %c0_47 = arith.constant 0 : index
      %57 = vector.load %arg6[%c2_45, %c0_46, %c0_47] : memref<4x1x128xf32, #tpu.memory_space<vmem>>, vector<1x1x128xf32>
      %58 = vector.shape_cast %57 : vector<1x1x128xf32> to vector<1x128xf32>
      %59 = vector.broadcast %58 : vector<1x128xf32> to vector<9x128xf32>
      %60 = arith.addf %56, %59 : vector<9x128xf32>
      %cst_48 = arith.constant 0.000000e+00 : f32
      %61 = vector.broadcast %cst_48 : f32 to vector<9x128xf32>
      %62 = arith.maximumf %60, %61 : vector<9x128xf32>
      %63 = arith.truncf %62 : vector<9x128xf32> to vector<9x128xbf16>
      %c0_49 = arith.constant 0 : index
      %c5 = arith.constant 5 : index
      %c0_50 = arith.constant 0 : index
      %64 = vector.load %arg7[%c0_49, %c5, %c0_50] : memref<1x50x128xbf16, #tpu.memory_space<vmem>>, vector<1x9x128xbf16>
      %65 = vector.shape_cast %64 : vector<1x9x128xbf16> to vector<9x128xbf16>
      %66 = vector.shape_cast %63 : vector<9x128xbf16> to vector<1x9x128xbf16>
      tpu.vector_store %arg7[%c0_49, %c5, %c0_50], %66 {strides = array<i32>} : memref<1x50x128xbf16, #tpu.memory_space<vmem>>, vector<1x9x128xbf16>,
      %67 = vector.extract_strided_slice %14 {offsets = [14, 0], sizes = [36, 16], strides = [1, 1]} : vector<50x16xbf16> to vector<36x16xbf16>
      %c3 = arith.constant 3 : index
      %c0_51 = arith.constant 0 : index
      %c0_52 = arith.constant 0 : index
      %68 = vector.load %arg4[%c3, %c0_51, %c0_52] : memref<4x16x128xbf16, #tpu.memory_space<vmem>>, vector<1x16x128xbf16>
      %69 = vector.shape_cast %68 : vector<1x16x128xbf16> to vector<16x128xbf16>
      %cst_53 = arith.constant dense<0.000000e+00> : vector<36x128xf32>
      %70 = tpu.matmul %67, %69, %cst_53 {dimension_numbers = #tpu.dot_dimension_numbers<[1], [0], [0], [1], [0, 0, 1, 1], [], []>} : vector<36x16xbf16>, vector<16x128xbf16>, vector<36x128xf32> -> vector<36x128xf32>
      %c3_54 = arith.constant 3 : index
      %c0_55 = arith.constant 0 : index
      %c0_56 = arith.constant 0 : index
      %71 = vector.load %arg5[%c3_54, %c0_55, %c0_56] : memref<4x1x128xf32, #tpu.memory_space<vmem>>, vector<1x1x128xf32>
      %72 = vector.shape_cast %71 : vector<1x1x128xf32> to vector<1x128xf32>
      %73 = vector.broadcast %72 : vector<1x128xf32> to vector<36x128xf32>
      %74 = arith.mulf %70, %73 : vector<36x128xf32>
      %c3_57 = arith.constant 3 : index
      %c0_58 = arith.constant 0 : index
      %c0_59 = arith.constant 0 : index
      %75 = vector.load %arg6[%c3_57, %c0_58, %c0_59] : memref<4x1x128xf32, #tpu.memory_space<vmem>>, vector<1x1x128xf32>
      %76 = vector.shape_cast %75 : vector<1x1x128xf32> to vector<1x128xf32>
      %77 = vector.broadcast %76 : vector<1x128xf32> to vector<36x128xf32>
      %78 = arith.addf %74, %77 : vector<36x128xf32>
      %cst_60 = arith.constant 0.000000e+00 : f32
      %79 = vector.broadcast %cst_60 : f32 to vector<36x128xf32>
      %80 = arith.maximumf %78, %79 : vector<36x128xf32>
      %81 = arith.truncf %80 : vector<36x128xf32> to vector<36x128xbf16>
      %c0_61 = arith.constant 0 : index
      %c14 = arith.constant 14 : index
      %c0_62 = arith.constant 0 : index
      %82 = vector.load %arg7[%c0_61, %c14, %c0_62] : memref<1x50x128xbf16, #tpu.memory_space<vmem>>, vector<1x36x128xbf16>
      %83 = vector.shape_cast %82 : vector<1x36x128xbf16> to vector<36x128xbf16>
      %84 = vector.shape_cast %81 : vector<36x128xbf16> to vector<1x36x128xbf16>
      tpu.vector_store %arg7[%c0_61, %c14, %c0_62], %84 {strides = array<i32>} : memref<1x50x128xbf16, #tpu.memory_space<vmem>>, vector<1x36x128xbf16>,
    } else {
    }
    return
  }
  func.func @transform_0(%arg0: i32, %arg1: i32) -> (i32, i32, i32) {
    %c0_i32 = arith.constant 0 : i32
    %c0_i32_0 = arith.constant 0 : i32
    return %arg0, %arg1, %c0_i32 : i32, i32, i32
  }
  func.func @transform_1(%arg0: i32, %arg1: i32) -> (i32, i32) {
    %c0_i32 = arith.constant 0 : i32
    %c0_i32_0 = arith.constant 0 : i32
    return %c0_i32, %arg1 : i32, i32
  }
  func.func @transform_2(%arg0: i32, %arg1: i32) -> (i32, i32, i32) {
    %c0_i32 = arith.constant 0 : i32
    %c0_i32_0 = arith.constant 0 : i32
    %c0_i32_1 = arith.constant 0 : i32
    %c0_i32_2 = arith.constant 0 : i32
    return %c0_i32, %c0_i32_0, %c0_i32_1 : i32, i32, i32
  }
  func.func @transform_3(%arg0: i32, %arg1: i32) -> (i32, i32, i32) {
    %c0_i32 = arith.constant 0 : i32
    %c0_i32_0 = arith.constant 0 : i32
    %c0_i32_1 = arith.constant 0 : i32
    %c0_i32_2 = arith.constant 0 : i32
    return %c0_i32, %c0_i32_0, %c0_i32_1 : i32, i32, i32
  }
  func.func @transform_4(%arg0: i32, %arg1: i32) -> (i32, i32, i32) {
    %c0_i32 = arith.constant 0 : i32
    %c0_i32_0 = arith.constant 0 : i32
    %c0_i32_1 = arith.constant 0 : i32
    %c0_i32_2 = arith.constant 0 : i32
    return %c0_i32, %c0_i32_0, %c0_i32_1 : i32, i32, i32
  }
  func.func @transform_5(%arg0: i32, %arg1: i32) -> (i32, i32, i32) {
    %c0_i32 = arith.constant 0 : i32
    %c0_i32_0 = arith.constant 0 : i32
    %c0_i32_1 = arith.constant 0 : i32
    return %arg0, %c0_i32, %c0_i32_0 : i32, i32, i32
  }
}

</mosaic_0001>

<bundles_post_ra>
// kernel: tpu_custom_call.1
= control target key start
LH: loop header
LB: loop body
LE: loop exit
PB: predicated region body
PF: predicated region fallthrough
CT: control target
= control target key end

     0   :  { %s1396_s18 = smov 0   ;;  %s1398_s19 = smov 0   ;;  %s1612_s0 = inlined_call_operand.vmem [shape: bf16[2,256,16], index: 0, kind: input, shape index: {}]   ;;  %s1613_s1 = inlined_call_operand.vmem [shape: bf16[50,256], index: 1, kind: input, shape index: {}]   ;;  %s1614_s2 = inlined_call_operand.vmem [shape: bf16[4,16,128], index: 2, kind: input, shape index: {}]   ;;  %s1615_s3 = inlined_call_operand.vmem [shape: f32[4,1,128], index: 3, kind: input, shape index: {}]   ;;  %s1616_s4 = inlined_call_operand.vmem [shape: f32[4,1,128], index: 4, kind: input, shape index: {}]   ;;  %s1617_s5 = inlined_call_operand.vmem [shape: bf16[2,50,128], index: 5, kind: output, shape index: {}]  }
   0x1   :  { %s1400_s20 = smov 0   ;;  %s1402_s21 = smov 0  }
   0x2   :  { %s1404_s22 = smov 0   ;;  %s1406_s23 = smov 0  }
   0x3   :  { %s1408_s24 = smov 0  }
   0x4 LB: > { %s24_s25 = sadd.s32 1, %s1353_s22  ;;  %s27_s26 = sadd.s32 1, %s1357_s23  ;;  %s1361_s24 = sphi %s1408_s24, %s15_s24   ;;  %s1357_s23 = sphi %s1406_s23, %s1627_s23   ;;  %s1353_s22 = sphi %s1404_s22, %s1626_s22   ;;  %s1349_s21 = sphi %s1402_s21, %s1625_s21   ;;  %s1345_s20 = sphi %s1400_s20, %s1624_s20   ;;  %s1341_s19 = sphi %s1398_s19, %s1623_s19   ;;  %s1337_s18 = sphi %s1396_s18, %s1622_s18  }
   0x5   : > { %p25_p0 = scmp.ge.s32.totalorder %s24_s25, 2  ;;  %s62_s27 = sadd.s32 1, %s1341_s19 }
   0x6   : > { %p69_p1 = scmp.ne.s32.totalorder %s1341_s19, %s1337_s18  ;;  %p70_p2 = scmp.eq.s32.totalorder %s1361_s24, 0 }
   0x7   : > { %s1629_s25 = smov (%p25_p0, %s24_s25), 0  ;;  %s1631_s26 = smov (!%p25_p0, %s27_s26), %s1357_s23 }
   0x8   : > { %s59_s28 = ssub.s32 %s1353_s22, %s1629_s25  ;;  %p71_p3 = por %p70_p2, %p69_p1 }
   0x9   : > { %p29_p4 = scmp.ge.s32.totalorder %s1631_s26, 2  ;;  %p60_p5 = scmp.eq.s32.totalorder %s59_s28, 0 }
   0xa   : > { %p1068_p6 = scmp.ge.s32.totalorder %s1361_s24, 4 }
   0xb   : > { %s1633_s26 = smov (%p29_p4, %s1631_s26), 0 }
   0xc   : > { %s1445_s29 = scalar_select %p60_p5, %s1341_s19, %s62_s27  }
   0xd   : > { %193 = sbr.rel (%p1068_p6) target bundleno = 29 (0x1d), region = 28 }
  0x14   : > { %209 = sbr.rel (!%p71_p3) target bundleno = 29 (0x1d), region = 36  ;;  %s211_s30 = sand.u32 (%p71_p3), 1, %s1341_s19  }
  0x15   : > { %s1069_s6 = sshll.u32 (%p71_p3), %s1353_s22, 2  ;;  %s1229_s7 = smul.u32 (%p71_p3), 28, %s211_s30 }
  0x16   : > { %s215_s10 = scalar_lea.vmem (%p71_p3), %s1613_s1, %s1069_s6 }
  0x17   : > { %v231_v0 = vld [vmem:[%s215_s10] sm:$0xf] (%p71_p3)  ;;  %v233_v1 = vld [vmem:[%s215_s10 + $0x8] sm:$0xf] (%p71_p3)  ;;  %v235_v2 = vld [vmem:[%s215_s10 + $0x10] sm:$0xf] (%p71_p3) }
  0x18   : > { %v237_v3 = vld [vmem:[%s215_s10 + $0x18] sm:$0xf] (%p71_p3)  ;;  %v239_v4 = vld [vmem:[%s215_s10 + $0x20] sm:$0xf] (%p71_p3)  ;;  %s213_s11 = scalar_lea.vmem (%p71_p3), [#allocation3], %s1229_s7 }
  0x19   : > { %232 = vst [vmem:[%s213_s11] sm:$0xf] (%p71_p3), %v231_v0  ;;  %234 = vst [vmem:[%s213_s11 + $0x4] sm:$0xf] (%p71_p3), %v233_v1  ;;  %v241_v5 = vld [vmem:[%s215_s10 + $0x28] sm:$0xf] (%p71_p3) }
  0x1a   : > { %236 = vst [vmem:[%s213_s11 + $0x8] sm:$0xf] (%p71_p3), %v235_v2  ;;  %238 = vst [vmem:[%s213_s11 + $0xc] sm:$0xf] (%p71_p3), %v237_v3  ;;  %v243_v6 = vld [vmem:[%s215_s10 + $0x30] sm:$0xf] (%p71_p3) }
  0x1b   : > { %240 = vst [vmem:[%s213_s11 + $0x10] sm:$0xf] %v239_v4  ;;  %242 = vst [vmem:[%s213_s11 + $0x14] sm:$0xf] %v241_v5 }
  0x1c   : > { %244 = vst [vmem:[%s213_s11 + $0x18] sm:$0xf] %v243_v6 }
  0x1d PF: > { %p1070_p7 = scmp.ge.s32.totalorder %s1361_s24, 1  ;;  %p280_p8 = scmp.lt.s32.totalorder %s1361_s24, 5 }
  0x1f   : > { %p281_p9 = pnand %p1070_p7, %p280_p8 }
  0x20   : > { %s287_s12 = sand.u32 (!%p281_p9), 1, %s1337_s18   ;;  %s1071_s13 = sshll.u32 (!%p281_p9), %s1345_s20, 4 }
  0x21   : > { %284 = sbr.rel (%p281_p9) target bundleno = 555 (0x22b), region = 77  ;;  %p324_p10 = scmp.lt.s32.totalorder (!%p281_p9), %s1349_s21, 1 }
  0x22   : > { %s1230_s14 = smul.u32 (!%p281_p9), 28, %s287_s12  ;;  %p326_p11 = scmp.lt.s32.totalorder (!%p281_p9), %s1071_s13, 31 }
  0x23   : > { %p1075_p12 = scmp.ne.s32.totalorder (!%p281_p9), %s1345_s20, 0 }
  0x24   : > { %s1469_s18 = scalar_lea.vmem (!%p281_p9), [#allocation3], %s1230_s14 }
  0x28   : > { %s1635_s21 = smov (!%p324_p10, %s1349_s21), 1  ;;  %s1637_s13 = smov (!%p326_p11, %s1071_s13), 31 }
  0x29   : > { %s1072_s15 = sshll.u32 %s1635_s21, 5  ;;  %s1231_s16 = smul.u32 28, %s1635_s21  ;;  %vm343_vm0 = vcmask (!%p1075_p12), 130048   ;;  %vm350_vm1 = vcmask (!%p1075_p12), 123904   ;;  %v1363_v7 = vmov (!%p1075_p12), 0.0  }
  0x2a   : > { %s329_s17 = sadd.s32 %s1072_s15, %s1637_s13  ;;  %342 = sbr.rel (%p1075_p12) target bundleno = 49 (0x31), region = 85  ;;  %344 = vst.msk [vmem:[#allocation2] sm:$0xff] (!%p1075_p12), %vm343_vm0, %v1363_v7  ;;  %345 = vst.msk [vmem:[#allocation2 + $0x8] sm:$0xff] (!%p1075_p12), %vm343_vm0, %v1363_v7 }
  0x2b   : > { %s1073_s27 = sshll.u32 %s329_s17, 2  ;;  %s1462_s6 = scalar_lea.vmem %s1617_s5, %s1231_s16  ;;  %346 = vst.msk [vmem:[#allocation2 + $0x10] sm:$0xff] (!%p1075_p12), %vm343_vm0, %v1363_v7  ;;  %347 = vst.msk [vmem:[#allocation2 + $0x18] sm:$0xff] (!%p1075_p12), %vm343_vm0, %v1363_v7 }
  0x2c   : > { %s1467_s9 = scalar_lea.vmem %s1612_s0, %s1073_s27  ;;  %348 = vst.msk [vmem:[#allocation2 + $0x20] sm:$0xff] (!%p1075_p12), %vm343_vm0, %v1363_v7  ;;  %349 = vst.msk [vmem:[#allocation2 + $0x28] sm:$0xff] (!%p1075_p12), %vm343_vm0, %v1363_v7 }
  0x2d   : > { %351 = vst.msk [vmem:[#allocation2 + $0x30] sm:$0x3] (!%p1075_p12), %vm350_vm1, %v1363_v7 }
  0x31 PF: > { %v1291_v8 = vld [vmem:[%s1467_s9] sm:$0xff]   ;;  %v1292_v9 = vld [vmem:[%s1467_s9 + $0x8] sm:$0xff]   ;;  %v1293_v10 = vld [vmem:[%s1467_s9 + $0x10] sm:$0xff]   ;;  %vm523_vm2 = vcmask 130048   ;;  %vm530_vm3 = vcmask 123904   ;;  %p1088_p13 = scmp.ne.s32.totalorder %s1345_s20, 1 }
  0x32   : > { %1157 = vmatprep.subr.bf16.mxu0 %v1291_v8  ;;  %1213 = vmatprep.subr.bf16.mxu1 %v1291_v8  ;;  %v1294_v11 = vld [vmem:[%s1467_s9 + $0x18] sm:$0xff]   ;;  %v1300_v13 = vld [vmem:[%s1469_s18 + $0x10] sm:$0xff]   ;;  %v1297_v16 = vld [vmem:[%s1467_s9 + $0x30] sm:$0xff]   ;;  %v1364_v43 = vmov (!%p1088_p13), 0.0   ;;  %vm1365_vm4 = vmmov (!%p1088_p13), 0   ;;  %vm604_vm5 = vcmask (!%p1088_p13), 1040384  }
  0x33   : > { %1158 = vmatpush3.bf16.msra.mxu0 %v1291_v8  ;;  %1221 = vmatpush3.bf16.msra.mxu1 %v1291_v8  ;;  %v1299_v12 = vld [vmem:[%s1469_s18] sm:$0xff]   ;;  %v1295_v14 = vld [vmem:[%s1467_s9 + $0x20] sm:$0xff]   ;;  %v1296_v15 = vld [vmem:[%s1467_s9 + $0x28] sm:$0xff]   ;;  %vm605_vm6 = vsmask.f32 (!%p1088_p13), 256  ;;  %vm699_vm8 = vcmask (!%p1088_p13), 1042432  }
  0x34   : > { %1159 = vmatprep.subr.bf16.mxu0 %v1292_v9  ;;  %1214 = vmatprep.subr.bf16.mxu1 %v1292_v9  ;;  %v1298_v17 = vld [vmem:[%s1467_s9 + $0x38] sm:$0xff]   ;;  %v1302_v19 = vld [vmem:[%s1469_s18 + $0x18] ss:$0 sps:$4 sm:$0x11]   ;;  %v352_v22 = vld [vmem:[#allocation2] sm:$0xff]  ;;  %vm947_vm9 = vcmask (!%p1088_p13), 1046532  }
  0x35   : > { %1173 = vmatprep.mubr.bf16.mxu0 %v1299_v12  ;;  %1177 = vmatprep.mubr.bf16.mxu1 %v1300_v13  ;;  %v1301_v18 = vld [vmem:[%s1469_s18 + $0x8] sm:$0xff]   ;;  %v354_v20 = vld [vmem:[#allocation2 + $0x10] sm:$0xff]  ;;  %v353_v31 = vld [vmem:[#allocation2 + $0x8] sm:$0xff]  ;;  %vm700_vm11 = vsmask.f32 (!%p1088_p13), 2306  ;;  %vm808_vm13 = vcmask (!%p1088_p13), 1043458  }
  0x36   : > { %v358_v21 = vld [vmem:[#allocation2 + $0x30] sm:$0x3]  ;;  %v356_v23 = vld [vmem:[#allocation2 + $0x20] sm:$0xff]  ;;  %v355_v26 = vld [vmem:[#allocation2 + $0x18] sm:$0xff]  ;;  %vm809_vm14 = vsmask.f32 (!%p1088_p13), 7946 }
  0x37   : > { %1160 = vmatpush3.bf16.msra.mxu0 %v1292_v9  ;;  %1222 = vmatpush3.bf16.msra.mxu1 %v1292_v9  ;;  %v357_v32 = vld [vmem:[#allocation2 + $0x28] sm:$0xff]  ;;  %v1303_v42 = vld [vmem:[%s1614_s2] sm:$0xff] (!%p1088_p13)   ;;  %v1304_v44 = vld [vmem:[%s1614_s2 + $0x18] sm:$0xff] (!%p1088_p13)   ;;  %vm789_vm15 = vsmask.f32 (!%p1088_p13), 2304 }
  0x38   : > { %1161 = vmatprep.subr.bf16.mxu0 %v1293_v10  ;;  %1215 = vmatprep.subr.bf16.mxu1 %v1293_v10  ;;  %v1305_v51 = vld [vmem:[%s1614_s2 + $0x8] sm:$0xff] (!%p1088_p13)   ;;  %v1306_v63 = vld [vmem:[%s1614_s2 + $0x10] sm:$0xff] (!%p1088_p13)   ;;  %v598_v8 = vld [vmem:[%s1615_s3] sm:$0x1] (!%p1088_p13)  ;;  %vm790_vm0 = vsmask.f32 (!%p1088_p13), 6416 }
  0x39   : > { %vm606_vm7 = vmand (!%p1088_p13), %vm604_vm5, %vm605_vm6 }
  0x3a   : > { %vm1549_vm10 = vmor (!%p1088_p13), %vm699_vm8, %vm947_vm9 }
  0x3b   : > { %1162 = vmatpush3.bf16.msra.mxu0 %v1293_v10  ;;  %1223 = vmatpush3.bf16.msra.mxu1 %v1293_v10  ;;  %v600_v10 = vld [vmem:[%s1616_s4] sm:$0x1] (!%p1088_p13)  ;;  %vm1567_vm12 = vmand (!%p1088_p13), %vm699_vm8, %vm700_vm11 }
  0x3c   : > { %1163 = vmatprep.subr.bf16.mxu0 %v1294_v11  ;;  %1216 = vmatprep.subr.bf16.mxu1 %v1294_v11  ;;  %vm810_vm1 = vmand (!%p1088_p13), %vm808_vm13, %vm809_vm14 }
  0x3f   : > { %1164 = vmatpush3.bf16.msra.mxu0 %v1294_v11  ;;  %1224 = vmatpush3.bf16.msra.mxu1 %v1294_v11 }
  0x40   : > { %1165 = vmatprep.subr.bf16.mxu0 %v1295_v14  ;;  %1217 = vmatprep.subr.bf16.mxu1 %v1295_v14 }
  0x43   : > { %1166 = vmatpush3.bf16.msra.mxu0 %v1295_v14  ;;  %1225 = vmatpush3.bf16.msra.mxu1 %v1295_v14  ;;  %v1527_v14 = vld [vmem:[%s1615_s3 + $0x3] ss:$0 sm:$0xff] (!%p1088_p13) }
  0x44   : > { %1167 = vmatprep.subr.bf16.mxu0 %v1296_v15  ;;  %1218 = vmatprep.subr.bf16.mxu1 %v1296_v15 }
  0x47   : > { %1168 = vmatpush3.bf16.msra.mxu0 %v1296_v15  ;;  %1226 = vmatpush3.bf16.msra.mxu1 %v1296_v15 }
  0x48   : > { %1169 = vmatprep.subr.bf16.mxu0 %v1297_v16  ;;  %1219 = vmatprep.subr.bf16.mxu1 %v1297_v16 }
  0x4b   : > { %1170 = vmatpush3.bf16.msra.mxu0 %v1297_v16  ;;  %1227 = vmatpush3.bf16.msra.mxu1 %v1297_v16 }
  0x4c   : > { %1171 = vmatprep.subr.bf16.mxu0 %v1298_v17  ;;  %1220 = vmatprep.subr.bf16.mxu1 %v1298_v17 }
  0x4f   : > { %1172 = vmatpush3.bf16.msra.mxu0 %v1298_v17  ;;  %1228 = vmatpush3.bf16.msra.mxu1 %v1298_v17 }
  0x50   : > { %1181 = vmatprep.subr.bf16.mxu0 (!%p1088_p13), %v1364_v43  ;;  %1199 = vmatprep.subr.bf16.mxu1 (!%p1088_p13), %v1364_v43 }
  0x52   : > { %1174 = vmatmul.mubr.bf16.vlgmr.msra.gmra.mrb[0].mxu0 %v1301_v18  ;;  %1178 = vmatmul.mubr.bf16.vlgmr.msra.gmra.mrb[0].mxu1 %v1302_v19  ;;  %v1532_v18 = vld [vmem:[%s1616_s4 + $0x3] ss:$0 sm:$0xff] (!%p1088_p13) }
  0x53   : > { %1182 = vmatpush3.bf16.msra.mxu0 (!%p1088_p13), %v1303_v42  ;;  %1183 = vmatprep.mubr.msk.bf16.mxu0 (!%p1088_p13), %vm1365_vm4, %v1364_v43 }
  0x54   : > { %1200 = vmatpush3.bf16.msra.mxu1 (!%p1088_p13), %v1304_v44  ;;  %1201 = vmatprep.mubr.msk.bf16.mxu1 (!%p1088_p13), %vm1365_vm4, %v1364_v43 }
  0x55   : > { %1187 = vmatprep.subr.bf16.mxu0 (!%p1088_p13), %v1364_v43 }
 0x125   : > { %v1175_v24 = vpop.f32.mrb[0].mxu0  ;;  %v1179_v25 = vpop.f32.mrb[0].mxu1 }
 0x126   : > { %v518_v27 = vadd.f32 %v1175_v24, %v354_v20  ;;  %v522_v28 = vadd.f32 %v1179_v25, %v358_v21  ;;  %v486_v29 = vpop.f32.mrb[1].mxu0  ;;  %v502_v30 = vpop.f32.mrb[1].mxu1  ;;  %535 = sbr.rel (%p1088_p13) target bundleno = 555 (0x22b), region = 89  ;;  %v1096_v24 = vld [vmem:[%s1615_s3 + $0x1] ss:$0 sm:$0xff] (!%p1088_p13) }
 0x127   : > { %v516_v33 = vadd.f32 %v486_v29, %v352_v22  ;;  %v520_v34 = vadd.f32 %v502_v30, %v356_v23  ;;  %v1176_v35 = vpop.f32.mrb[2].mxu0  ;;  %v1180_v36 = vpop.f32.mrb[2].mxu1  ;;  %v607_v22 = vld [vmem:[%s1462_s6] sm:$0x1] (!%p1088_p13)  ;;  %v1098_v30 = vld [vmem:[%s1616_s4 + $0x1] ss:$0 sm:$0xff] (!%p1088_p13) }
 0x128   : > { %526 = vst.msk [vmem:[#allocation2 + $0x10] sm:$0xff] %vm523_vm2, %v518_v27  ;;  %v519_v37 = vadd.f32 %v1176_v35, %v355_v26  ;;  %v489_v38 = vpop.f32.mrb[3].mxu0  ;;  %v505_v39 = vpop.f32.mrb[3].mxu1 }
 0x129   : > { %531 = vst.msk [vmem:[#allocation2 + $0x30] sm:$0x3] %vm530_vm3, %v522_v28  ;;  %v517_v40 = vadd.f32 %v489_v38, %v353_v31  ;;  %v521_v41 = vadd.f32 %v505_v39, %v357_v32 }
 0x12a   : > { %524 = vst.msk [vmem:[#allocation2] sm:$0xff] %vm523_vm2, %v516_v33  ;;  %528 = vst.msk [vmem:[#allocation2 + $0x20] sm:$0xff] %vm523_vm2, %v520_v34 }
 0x12b   : > { %527 = vst.msk [vmem:[#allocation2 + $0x18] sm:$0xff] %vm523_vm2, %v519_v37  ;;  %525 = vst.msk [vmem:[#allocation2 + $0x8] sm:$0xff] %vm523_vm2, %v517_v40 }
 0x12c   : > { %529 = vst.msk [vmem:[#allocation2 + $0x28] sm:$0xff] %vm523_vm2, %v521_v41 }
 0x12f   : > { %v538_v47 = vld [vmem:[#allocation2 + $0x10] sm:$0xff] }
 0x130   : > { %v542_v0 = vld [vmem:[#allocation2 + $0x30] sm:$0x3] }
 0x131   : > { %v536_v45 = vld [vmem:[#allocation2] sm:$0xff]  ;;  %v546_v4 = vpack.c.bf16 %v542_v0, %v542_v0 }
 0x132   : > { %v537_v46 = vld [vmem:[#allocation2 + $0x8] sm:$0xff]  ;;  %v539_v49 = vld [vmem:[#allocation2 + $0x18] sm:$0xff]  ;;  %v540_v52 = vld [vmem:[#allocation2 + $0x20] sm:$0xff] }
 0x133   : > { %v543_v48 = vpack.c.bf16 %v537_v46, %v536_v45  ;;  %v544_v50 = vpack.c.bf16 %v539_v49, %v538_v47  ;;  %v541_v56 = vld [vmem:[#allocation2 + $0x28] sm:$0xff]  ;;  %v827_v6 = vrot.slane %v546_v4, 7 }
 0x134   : > { %v545_v58 = vpack.c.bf16 %v541_v56, %v540_v52 }
 0x135   : > { %1184 = vmatmul.mubr.msk.bf16.vlgmr.msra.gmra.mrb[0].mxu0 %vm523_vm2, %v543_v48  ;;  %v822_v53 = vrot.slane %v543_v48, 7  ;;  %v613_v54 = vshrl.u32 %v543_v48, 16  ;;  %v615_v55 = vshll.u32 %v543_v48, 16  ;;  %v823_v57 = vrot.slane %v544_v50, 7 }
 0x136   : > { %1188 = vmatpush3.bf16.msra.mxu0 %v1305_v51  ;;  %1189 = vmatprep.mubr.msk.bf16.mxu0 %vm1365_vm4, %v1364_v43  ;;  %v825_v62 = vrot.slane %v545_v58, 7 }
 0x137   : > { %v617_v59 = vrot.slane %v615_v55, 1  ;;  %1193 = vmatprep.subr.bf16.mxu0 %v1364_v43  ;;  %v824_v60 = vsel %vm604_vm5, %v822_v53, %v823_v57  ;;  %v708_v1 = vrot.slane %v613_v54, 2  ;;  %v709_v2 = vrot.slane %v615_v55, 3 }
 0x138   : > { %1202 = vmatmul.mubr.msk.bf16.vlgmr.msra.gmra.mrb[0].mxu1 %vm523_vm2, %v824_v60  ;;  %v826_v3 = vsel %vm604_vm5, %v823_v57, %v825_v62  ;;  %v828_v7 = vsel %vm604_vm5, %v825_v62, %v827_v6 }
 0x139   : > { %v618_v61 = vor.u32 %v617_v59, %v613_v54  ;;  %1205 = vmatprep.mubr.msk.bf16.mxu1 %vm1365_vm4, %v1364_v43  ;;  %v710_v5 = vor.u32 %v709_v2, %v708_v1  ;;  %v1105_v54 = vld [vmem:[%s1615_s3 + $0x2] ss:$0 sm:$0xff] }
 0x13a   : > { %v1107_v59 = vld [vmem:[%s1616_s4 + $0x2] ss:$0 sm:$0xff] }
 0x13d   : > { %1190 = vmatmul.mubr.msk.bf16.vlgmr.msra.gmra.mrb[4].mxu0 %vm523_vm2, %v618_v61 }
 0x13e   : > { %1194 = vmatpush3.bf16.msra.mxu0 %v1306_v63  ;;  %1195 = vmatprep.mubr.msk.bf16.mxu0 %vm1365_vm4, %v1364_v43 }
 0x140   : > { %1206 = vmatmul.mubr.msk.bf16.gmra.mrb[4].mxu1 %vm523_vm2, %v826_v3 }
 0x141   : > { %1209 = vmatprep.mubr.msk.bf16.mxu1 %vm1365_vm4, %v1364_v43 }
 0x145   : > { %1196 = vmatmul.mubr.msk.bf16.vlgmr.msra.gmra.mrb[8].mxu0 %vm523_vm2, %v710_v5 }
 0x148   : > { %1210 = vmatmul.mubr.msk.bf16.gmra.mrb[8].mxu1 %vm523_vm2, %v828_v7  ;;  %vm791_vm2 = vmor %vm789_vm15, %vm790_vm0 }
 0x208   : > { %v592_v9 = vpop.f32.mrb[0].mxu0 }
 0x209   : > { %v599_v11 = vmul.f32 %v598_v8, %v592_v9  ;;  %v1185_v12 = vpop.f32.mrb[1].mxu0 }
 0x20a   : > { %v595_v13 = vpop.f32.mrb[2].mxu0 }
 0x20b   : > { %v601_v15 = vadd.f32 %v600_v10, %v599_v11  ;;  %v1186_v16 = vpop.f32.mrb[3].mxu0  ;;  %v878_v17 = vpop.f32.mrb[0].mxu1 }
 0x20c   : > { %v908_v20 = vmul.f32 %v1527_v14, %v878_v17  ;;  %v1203_v21 = vpop.f32.mrb[1].mxu1 }
 0x20d   : > { %v602_v19 = vmax.f32 %v601_v15, 0.0  ;;  %v881_v23 = vpop.f32.mrb[2].mxu1 }
 0x20e   : > { %v921_v26 = vadd.f32 %v1532_v18, %v908_v20  ;;  %v909_v27 = vmul.f32 %v1527_v14, %v881_v23  ;;  %v1204_v28 = vpop.f32.mrb[3].mxu1 }
 0x20f   : > { %v603_v25 = vpack.c.bf16 %v602_v19, %v602_v19 }
 0x210   : > { %v662_v29 = vpop.f32.mrb[4].mxu0  ;;  %v926_v32 = vmax.f32 %v921_v26, 0.0  ;;  %v922_v33 = vadd.f32 %v1532_v18, %v909_v27 }
 0x211   : > { %v608_v31 = vsel %vm606_vm7, %v603_v25, %v607_v22  ;;  %v676_v34 = vmul.f32 %v1096_v24, %v662_v29  ;;  %v1191_v35 = vpop.f32.mrb[5].mxu0 }
 0x212   : > { %609 = vst [vmem:[%s1462_s6] sm:$0x1] %v608_v31  ;;  %v665_v36 = vpop.f32.mrb[6].mxu0  ;;  %v1130_v37 = vpack.c.bf16 %v926_v32, %v926_v32  ;;  %v927_v38 = vmax.f32 %v922_v33, 0.0 }
 0x213   : > { %v685_v39 = vadd.f32 %v1098_v30, %v676_v34  ;;  %v1192_v40 = vpop.f32.mrb[7].mxu0  ;;  %v886_v41 = vpop.f32.mrb[4].mxu1 }
 0x214   : > { %v949_v42 = vrot.slane %v1130_v37, 5  ;;  %v1131_v43 = vpack.c.bf16 %v927_v38, %v927_v38  ;;  %v910_v45 = vmul.f32 %v1527_v14, %v886_v41  ;;  %v1207_v46 = vpop.f32.mrb[5].mxu1 }
 0x215   : > { %v686_v44 = vmax.f32 %v685_v39, 0.0  ;;  %v889_v48 = vpop.f32.mrb[6].mxu1 }
 0x216   : > { %v950_v49 = vrot.slane %v949_v42, 4  ;;  %969 = vst [vmem:[%s1462_s6 + $0x4] sm:$0x8] %v949_v42  ;;  %v951_v50 = vrot.slane %v1131_v43, 5  ;;  %v923_v52 = vadd.f32 %v1532_v18, %v910_v45  ;;  %v1208_v53 = vpop.f32.mrb[7].mxu1  ;;  %v911_v55 = vmul.f32 %v1527_v14, %v889_v48 }
 0x217   : > { %v1127_v51 = vpack.c.bf16 %v686_v44, %v686_v44 }
 0x218   : > { %v754_v56 = vpop.f32.mrb[8].mxu0  ;;  %v952_v57 = vsel %vm1549_vm10, %v950_v49, %v951_v50  ;;  %v928_v61 = vmax.f32 %v923_v52, 0.0  ;;  %v924_v62 = vadd.f32 %v1532_v18, %v911_v55  ;;  %v953_v15 = vrot.slane %v951_v50, 4 }
 0x219   : > { %v692_v58 = vshrl.u32 %v1127_v51, 16  ;;  %v1197_v60 = vpop.f32.mrb[9].mxu0  ;;  %970 = vst [vmem:[%s1462_s6 + $0x8] sm:$0xf] %v952_v57  ;;  %v769_v63 = vmul.f32 %v1105_v54, %v754_v56  ;;  %v695_v2 = vshll.u32 %v1127_v51, 16 }
 0x21a   : > { %v757_v0 = vpop.f32.mrb[10].mxu0  ;;  %v1132_v6 = vpack.c.bf16 %v928_v61, %v928_v61  ;;  %v929_v7 = vmax.f32 %v924_v62, 0.0  ;;  %v702_v16 = vld [vmem:[%s1462_s6] sm:$0x7] }
 0x21b   : > { %v694_v1 = vrot.slane %v692_v58, 7  ;;  %v770_v3 = vmul.f32 %v1105_v54, %v757_v0  ;;  %v1198_v4 = vpop.f32.mrb[11].mxu0  ;;  %v779_v8 = vadd.f32 %v1107_v59, %v769_v63  ;;  %v894_v9 = vpop.f32.mrb[8].mxu1 }
 0x21c   : > { %v912_v11 = vmul.f32 %v1527_v14, %v894_v9  ;;  %v1211_v13 = vpop.f32.mrb[9].mxu1  ;;  %v954_v17 = vrot.slane %v1132_v6, 5  ;;  %v1133_v19 = vpack.c.bf16 %v929_v7, %v929_v7 }
 0x21d   : > { %v697_v10 = vor.u32 %v695_v2, %v694_v1  ;;  %v780_v12 = vadd.f32 %v1107_v59, %v770_v3  ;;  %v781_v20 = vmax.f32 %v779_v8, 0.0  ;;  %v897_v21 = vpop.f32.mrb[10].mxu1 }
 0x21e   : > { %v925_v23 = vadd.f32 %v1532_v18, %v912_v11  ;;  %v1212_v25 = vpop.f32.mrb[11].mxu1  ;;  %v955_v14 = vsel %vm1549_vm10, %v953_v15, %v954_v17  ;;  %v956_v26 = vrot.slane %v954_v17, 4  ;;  %v957_v27 = vrot.slane %v1133_v19, 5 }
 0x21f   : > { %v703_v22 = vsel %vm1567_vm12, %v697_v10, %v702_v16  ;;  %v782_v24 = vmax.f32 %v780_v12, 0.0  ;;  %v1128_v28 = vpack.c.bf16 %v781_v20, %v781_v20  ;;  %971 = vst [vmem:[%s1462_s6 + $0xc] sm:$0xf] %v955_v14 }
 0x220   : > { %704 = vst [vmem:[%s1462_s6] sm:$0x7] %v703_v22  ;;  %v930_v29 = vmax.f32 %v925_v23, 0.0  ;;  %v958_v31 = vsel %vm1549_vm10, %v956_v26, %v957_v27  ;;  %v959_v37 = vrot.slane %v957_v27, 4 }
 0x221   : > { %v1129_v30 = vpack.c.bf16 %v782_v24, %v782_v24  ;;  %v793_v32 = vshrl.u32 %v1128_v28, 16  ;;  %v796_v18 = vshll.u32 %v1128_v28, 16  ;;  %972 = vst [vmem:[%s1462_s6 + $0x10] sm:$0xf] %v958_v31 }
 0x222   : > { %v1134_v33 = vpack.c.bf16 %v930_v29, %v930_v29 }
 0x223   : > { %v795_v34 = vrot.slane %v793_v32, 5  ;;  %v798_v35 = vrot.slane %v796_v18, 6  ;;  %v802_v36 = vshll.u32 %v1129_v30, 16 }
 0x224   : > { %v960_v38 = vrot.slane %v1134_v33, 5 }
 0x225   : > { %v799_v39 = vor.u32 %v798_v35, %v795_v34  ;;  %v804_v45 = vrot.slane %v802_v36, 6 }
 0x226   : > { %v961_v41 = vsel %vm1549_vm10, %v959_v37, %v960_v38  ;;  %v962_v42 = vrot.slane %v960_v38, 4 }
 0x227   : > { %v811_v40 = vld [vmem:[%s1462_s6] sm:$0xc]  ;;  %v800_v43 = vrot.slane %v799_v39, 4  ;;  %973 = vst [vmem:[%s1462_s6 + $0x14] sm:$0xf] %v961_v41 }
 0x228   : > { %v812_v44 = vsel %vm810_vm1, %v799_v39, %v811_v40  ;;  %974 = vst [vmem:[%s1462_s6 + $0x18] sm:$0x1] %v962_v42 }
 0x229   : > { %813 = vst [vmem:[%s1462_s6] sm:$0xc] %v812_v44  ;;  %v805_v46 = vsel %vm791_vm2, %v800_v43, %v804_v45 }
 0x22a   : > { %814 = vst [vmem:[%s1462_s6 + $0x4] sm:$0x7] %v805_v46 }
 0x22b PF: > { %s15_s24 = sadd.s32 1, %s1361_s24   ;;  %s1622_s18 = smov %s1341_s19 }
 0x22c   : > { %p12_p0 = scmp.ge.s32.totalorder %s15_s24, 6   ;;  %s1623_s19 = smov %s1445_s29 }
 0x22d   : > { %s1624_s20 = smov %s1353_s22  ;;  %s1625_s21 = smov %s1357_s23 }
 0x22e   : > { %s1626_s22 = smov %s1629_s25  ;;  %s1627_s23 = smov %s1633_s26 }
 0x22f   :  { %14 = sbr.rel (!%p12_p0) target bundleno = 4 (0x4), region = 136 }

</bundles_post_ra>
